<compile_context>
chip_gen: v6e
topology: v6e:2x2x1
jax: 0.10.0
libtpu: 0.0.40
codegen_flags: <defaults>
</compile_context>

<pallas_src>
import jax
import jax.numpy as jnp
import numpy as np
from jax.experimental import pallas as pl
from jax.experimental.pallas import tpu as pltpu


def _one_hot_kernel(vidx_ref, o_ref):
    # vidx_ref: (TILE_B, 1) int32 VMEM — per-graph target vocab index (-1 = none)
    # o_ref:    (TILE_B, VPAD) float32 VMEM output tile (VPAD multiple of 128)
    tgt = vidx_ref[...]                                        # (TILE_B, 1)
    col = jax.lax.broadcasted_iota(jnp.int32, o_ref.shape, 1)  # lane index
    o_ref[...] = jnp.where((col == tgt) & (tgt >= 0),
                           jnp.float32(1.0), jnp.float32(0.0))


def _round_up(x, m):
    return ((x + m - 1) // m) * m


def one_hot_rows(vocab_idx, num_vocab, *, vmem_tile_budget_bytes=8 << 20):
    """out[i, vocab_idx[i]] = 1.0; rows with vocab_idx[i] < 0 stay all-zero."""
    num_graphs = int(vocab_idx.shape[0])

    # Lane-dense output: pad the vocab (lane) axis to a multiple of 128.
    vpad = _round_up(max(int(num_vocab), 1), 128)

    # Tile the graph (sublane) axis: multiple of 8 (f32 sublane), sized so a
    # double-buffered f32 output tile stays well inside v7x's 64 MiB VMEM.
    max_rows = max(8, (vmem_tile_budget_bytes // (2 * vpad * 4)) // 8 * 8)
    tile_b = min(_round_up(num_graphs, 8), max_rows)
    bpad = _round_up(num_graphs, tile_b)

    vidx = jnp.full((bpad, 1), -1, dtype=jnp.int32)
    vidx = vidx.at[:num_graphs, 0].set(vocab_idx.astype(jnp.int32))

    out = pl.pallas_call(
        _one_hot_kernel,
        out_shape=jax.ShapeDtypeStruct((bpad, vpad), jnp.float32),
        grid_spec=pltpu.PrefetchScalarGridSpec(
            num_scalar_prefetch=0,
            grid=(bpad // tile_b,),
            in_specs=[pl.BlockSpec((tile_b, 1), lambda i: (i, 0))],
            out_specs=pl.BlockSpec((tile_b, vpad), lambda i: (i, 0)),
        ),
        compiler_params=pltpu.CompilerParams(
            dimension_semantics=("parallel",),   # independent tiles; 2-TC shard on v7x
            vmem_limit_bytes=32 << 20,           # explicit, safe on v7x (64 MiB phys)
        ),
    )(vidx)
    return out[:num_graphs, :num_vocab]


def guess_node_one_token_forward(x, node_depth, num_graphs, attr2vocab,
                                 num_vocab, max_seq_len):
    """JAX/Pallas equivalent of GuessNodeOneToken.forward(batched_data)."""
    # Step 1: node right after each depth-0 (root) node.  torch's nonzero() has a
    # data-dependent shape; each graph has exactly one root, so a fixed-size
    # nonzero is exact and keeps shapes static.
    root_rows = jnp.nonzero(node_depth.reshape(-1) == 0,
                            size=num_graphs, fill_value=0)[0] + 1
    attr_idx = x[root_rows, 1]                                  # (num_graphs,)

    # Step 2: attribute-index -> vocab-index table lookup (-1 == not in vocab).
    num_attr = attr2vocab.shape[0]
    in_range = (attr_idx >= 0) & (attr_idx < num_attr)
    vocab_idx = jnp.where(
        in_range, attr2vocab[jnp.clip(attr_idx, 0, num_attr - 1)], -1)

    # Step 3: Pallas one-hot kernel (the bulk of the output bytes).
    out = one_hot_rows(vocab_idx, num_vocab)

    # Step 4: prediction list — remaining steps are constant zeros.
    # TODO(synk): the PyTorch forward's debug print() calls are side effects and are omitted.
    zeros = jnp.zeros((num_graphs, num_vocab), jnp.float32)
    return [out] + [zeros] * (max_seq_len - 1)


if __name__ == "__main__":
    key = jax.random.PRNGKey(0)

    # Small synthetic batch mirroring an ogbg-code batched_data.
    num_graphs = 8
    nodes_per_graph = 8
    num_nodes = num_graphs * nodes_per_graph
    num_attr = 50          # node-attribute vocabulary size
    num_vocab = 200        # target vocabulary size (deliberately not a multiple of 128)
    max_seq_len = 4

    # __init__-equivalent: build attridx2vocabidx as an int32 table (-1 = missing).
    vocab2idx = {f"tok{j}": j for j in range(num_vocab)}
    nodeattr_mapping = {
        "attr idx": list(range(num_attr)),
        "attr": [f"tok{(7 * a) % (2 * num_vocab)}" for a in range(num_attr)],
    }
    attridx2vocabidx = {}
    table = np.full((num_attr,), -1, dtype=np.int32)
    for a, attr in zip(nodeattr_mapping["attr idx"], nodeattr_mapping["attr"]):
        if attr in vocab2idx:
            attridx2vocabidx[a] = vocab2idx[attr]
            table[a] = vocab2idx[attr]
    attr2vocab = jnp.asarray(table)

    # batched_data.x: (num_nodes, 2) int32; column 1 is the node-attribute id.
    k0, k1 = jax.random.split(key)
    x = jnp.stack(
        [jax.random.randint(k0, (num_nodes,), 0, 5, dtype=jnp.int32),
         jax.random.randint(k1, (num_nodes,), 0, num_attr, dtype=jnp.int32)],
        axis=1)
    # batched_data.node_depth: depth 0 only at each graph's first node.
    node_depth = jnp.tile(jnp.arange(nodes_per_graph, dtype=jnp.int32), num_graphs)

    pred_list = guess_node_one_token_forward(
        x, node_depth, num_graphs, attr2vocab, num_vocab, max_seq_len)
    pred_list = jax.block_until_ready(pred_list)

    # Reference: literal transcription of the PyTorch loops.
    x_np = np.asarray(x)
    depth_np = np.asarray(node_depth)
    idx = np.nonzero(depth_np == 0)[0] + 1
    attr_np = x_np[idx][:, 1]
    ref = np.zeros((num_graphs, num_vocab), dtype=np.float32)
    for i in range(num_graphs):
        a = int(attr_np[i])
        if a in attridx2vocabidx:
            ref[i, attridx2vocabidx[a]] = 1.0

    out = np.asarray(pred_list[0])
    assert len(pred_list) == max_seq_len
    assert out.shape == (num_graphs, num_vocab) and out.dtype == np.float32
    assert np.array_equal(out, ref)
    for t in range(1, max_seq_len):
        z = np.asarray(pred_list[t])
        assert z.shape == (num_graphs, num_vocab) and not np.any(z)

    print("KERNEL_OK")
</pallas_src>

<mosaic_0001>
module attributes {stable_mosaic.version = 11 : i64} {
  func.func @_one_hot_kernel(%arg0: i32, %arg1: memref<8x1xi32, #tpu.memory_space<vmem>>, %arg2: memref<8x256xf32, #tpu.memory_space<vmem>>) attributes {dimension_semantics = [#tpu.dimension_semantics<parallel>], iteration_bounds = array<i64: 1>, scalar_prefetch = 0 : i64, scratch_operands = 0 : i64, tpu.core_type = #tpu.core_type<tc>, window_params = [{transform_indices = @transform_0, window_bounds = array<i64: 8, 1>}, {transform_indices = @transform_1, window_bounds = array<i64: 8, 256>}]} {
    %c0 = arith.constant 0 : index
    %c0_0 = arith.constant 0 : index
    %0 = vector.load %arg1[%c0, %c0_0] : memref<8x1xi32, #tpu.memory_space<vmem>>, vector<8x1xi32>
    %1 = tpu.iota {dimensions = array<i32: 1>} : vector<8x256xi32>
    %2 = vector.broadcast %0 : vector<8x1xi32> to vector<8x256xi32>
    %3 = arith.cmpi eq, %1, %2 : vector<8x256xi32>
    %c0_i32 = arith.constant 0 : i32
    %4 = vector.broadcast %c0_i32 : i32 to vector<8x1xi32>
    %5 = arith.cmpi sge, %0, %4 : vector<8x1xi32>
    %6 = vector.broadcast %5 : vector<8x1xi1> to vector<8x256xi1>
    %7 = arith.andi %3, %6 : vector<8x256xi1>
    %cst = arith.constant 1.000000e+00 : f32
    %cst_1 = arith.constant 0.000000e+00 : f32
    %8 = vector.broadcast %cst : f32 to vector<8x256xf32>
    %9 = vector.broadcast %cst_1 : f32 to vector<8x256xf32>
    %10 = arith.select %7, %8, %9 : vector<8x256xi1>, vector<8x256xf32>
    %c0_2 = arith.constant 0 : index
    %c0_3 = arith.constant 0 : index
    %11 = vector.load %arg2[%c0_2, %c0_3] : memref<8x256xf32, #tpu.memory_space<vmem>>, vector<8x256xf32>
    tpu.vector_store %arg2[%c0_2, %c0_3], %10 {strides = array<i32>} : memref<8x256xf32, #tpu.memory_space<vmem>>, vector<8x256xf32>,
    return
  }
  func.func @transform_0(%arg0: i32) -> (i32, i32) {
    %c0_i32 = arith.constant 0 : i32
    %c0_i32_0 = arith.constant 0 : i32
    return %arg0, %c0_i32 : i32, i32
  }
  func.func @transform_1(%arg0: i32) -> (i32, i32) {
    %c0_i32 = arith.constant 0 : i32
    %c0_i32_0 = arith.constant 0 : i32
    return %arg0, %c0_i32 : i32, i32
  }
}

</mosaic_0001>

<bundles_post_ra>
// kernel: tpu_custom_call.1
= control target key start
LH: loop header
LB: loop body
LE: loop exit
PB: predicated region body
PF: predicated region fallthrough
CT: control target
= control target key end

     0   :  { %s89_s0 = inlined_call_operand.vmem [shape: s32[8,1], index: 0, kind: input, shape index: {}]   ;;  %s90_s1 = inlined_call_operand.hbm [shape: f32[8,256], index: 1, kind: output, shape index: {}]  }
   0x1   :  { %v9_v0 = vld [vmem:[%s89_s0] sm:$0xff] }
   0x2   :  { %6 = vsyncpa [#allocation3], 0  ;;  %v70_v1 = vmov 0   ;;  %vm18_vm0 = vcmp.ge.s32.totalorder %v9_v0, 0  ;;  %v10_v3 = vlaneseq  ;;  %s71_s8 = smov [#allocation2]   ;;  %v72_v8 = vmov 0.0  }
   0x3   :  { %47 = vset.pattern.permute.xlu0 %v70_v1  ;;  %v19_v2 = vsel %vm18_vm0, 1, %v70_v1  ;;  %s36_s9 = sshll.u32 %s71_s8, 4  ;;  %s37_s9 = int_to_ptr.vmem [resolvable:$true] %s36_s9 }
   0x4   :  { %14 = vperm.xlu0 %47, %v9_v0   ;;  %v11_v4 = vand.u32 127, %v10_v3  ;;  %s48_s0 = scalar_lea.vmem %s37_s9, 256  ;;  %p53_p1 = scmp.lt.s32.totalorder %s37_s9, %s37_s9 }
   0x5   :  { %p49_p0 = scmp.ne.s32.totalorder %s37_s9, %s48_s0  ;;  %p54_p2 = scmp.lt.s32.totalorder %s48_s0, %s48_s0 }
   0x6   :  { %v12_v6 = vadd.s32 128, %v11_v4 }
   0x7   :  { %p55_p3 = por %p54_p2, %p53_p1 }
   0x8   :  { %21 = vperm.xlu0 %47, %v19_v2  }
   0x9   :  { %p56_p4 = pnand %p55_p3, %p49_p0 }
  0x7f   :  { %v15_v5 = vpop.permute.xlu0 %14 }
  0x80   :  { %vm16_vm1 = vcmp.eq.s32.totalorder %v11_v4, %v15_v5  ;;  %vm17_vm3 = vcmp.eq.s32.totalorder %v12_v6, %v15_v5 }
  0x83   :  { %v22_v7 = vpop.permute.xlu0 %21 }
  0x84   :  { %vm23_vm2 = vcmp.eq.s32.totalorder %v22_v7, 1 }
  0x85   :  { %vm24_vm4 = vmand %vm16_vm1, %vm23_vm2 }
  0x86   :  { %vm25_vm5 = vmand %vm17_vm3, %vm23_vm2  ;;  %v26_v9 = vsel %vm24_vm4, 1.0, %v72_v8 }
  0x87   :  { %v27_v10 = vsel %vm25_vm5, 1.0, %v72_v8  ;;  %28 = vst [vmem:[#allocation2] sm:$0xff] %v26_v9 }
  0x88   :  { %29 = vst [vmem:[#allocation2 + $0x8] sm:$0xff] %v27_v10 }
  0x89   :  { %59 = shalt.err (!%p56_p4)
}
  0x8a   :  { %39 = dma.vmem_to_hbm [thread:$0]  %s37_s9, 256, %s90_s1, [#allocation3]  }
  0x8b   :  { %68 = dma.done.wait [#allocation3], 256  }
  0x8c   :  { %69 = vsyncadd [#allocation3], 4294967040 }
  0x8d   :  { %43 = vsyncpa [#allocation3], 1 }

</bundles_post_ra>
